<compile_context>
chip_gen: v5e
topology: v5e:2x2
jax: 0.10.0
libtpu: 0.0.40
codegen_flags: <defaults>
</compile_context>

<pallas_src>
import jax
import jax.numpy as jnp
from jax.experimental import pallas as pl
from jax.experimental.pallas import tpu as pltpu


def _dma_copy_kernel(x_hbm, o_hbm, sem):
    # Single whole-array HBM->HBM DMA; the DMA engine streams at HBM rate.
    cp = pltpu.make_async_copy(x_hbm, o_hbm, sem)
    cp.start()
    cp.wait()


def pallas_identity_copy(x):
    """Materialize a physical copy of x with one HBM->HBM DMA (no VMEM bounce)."""
    nbytes = int(x.size) * x.dtype.itemsize
    return pl.pallas_call(
        _dma_copy_kernel,
        out_shape=jax.ShapeDtypeStruct(x.shape, x.dtype),
        in_specs=[pl.BlockSpec(memory_space=pl.ANY)],
        out_specs=pl.BlockSpec(memory_space=pl.ANY),
        scratch_shapes=[pltpu.SemaphoreType.DMA(())],
        compiler_params=pltpu.CompilerParams(has_side_effects=True),
        cost_estimate=pl.CostEstimate(
            flops=0, transcendentals=0, bytes_accessed=2 * nbytes
        ),
    )(x)


def print_layer(x, *, force_copy=False):
    """Pallas equivalent of PrintLayer.forward: print(x.shape); return x.

    Hot path: zero data movement — just return x after printing the (static) shape.
    Set force_copy=True only if a distinct output buffer is actually required.
    """
    # PyTorch's PrintLayer prints on every forward. Shapes are static in JAX, so a
    # Python-level print is equivalent (fires per call in eager mode, at trace time
    # under jit).
    # TODO(synk): use jax.debug.print if per-invocation runtime printing under jit
    # is required; the shape itself is static either way.
    print(x.shape)

    if not force_copy:
        return x  # identity: the single largest win is doing no kernel at all
    return pallas_identity_copy(x)


if __name__ == "__main__":
    key = jax.random.PRNGKey(0)

    # NCHW input, consistent with a conv-style classifier feeding this layer.
    x = jax.random.normal(key, (2, 4, 16, 16), dtype=jnp.float32)

    # Hot path: pure identity, no data movement.
    y = print_layer(x)
    y = jax.block_until_ready(y)
    assert y.shape == x.shape and y.dtype == x.dtype
    assert bool(jnp.all(y == x))

    # Pallas path: single HBM->HBM DMA copy (exercised to prove the kernel runs).
    y_copy = print_layer(x, force_copy=True)
    y_copy = jax.block_until_ready(y_copy)
    assert y_copy.shape == x.shape and y_copy.dtype == x.dtype
    assert bool(jnp.all(y_copy == x))

    # Ragged, non-(8,128)-friendly shape: the whole-ref DMA handles it with no
    # padding, tiling, or VMEM residency concerns.
    x_ragged = jax.random.normal(key, (3, 5, 7), dtype=jnp.float32)
    y_ragged = print_layer(x_ragged, force_copy=True)
    y_ragged = jax.block_until_ready(y_ragged)
    assert y_ragged.shape == x_ragged.shape and y_ragged.dtype == x_ragged.dtype
    assert bool(jnp.all(y_ragged == x_ragged))

    print("KERNEL_OK")
</pallas_src>

<mosaic_0001>
module attributes {stable_mosaic.version = 11 : i64} {
  func.func @_dma_copy_kernel(%arg0: memref<2x4x16x16xf32, #tpu.memory_space<any>>, %arg1: memref<2x4x16x16xf32, #tpu.memory_space<any>>, %arg2: memref<!tpu.dma_semaphore, #tpu.memory_space<semaphore_mem>>) attributes {dimension_semantics = [], scalar_prefetch = 0 : i64, scratch_operands = 1 : i64, tpu.core_type = #tpu.core_type<tc>} {
    tpu.enqueue_dma source(%arg0 : memref<2x4x16x16xf32, #tpu.memory_space<any>>) target(%arg1 : memref<2x4x16x16xf32, #tpu.memory_space<any>>) target_semaphore(%arg2 : memref<!tpu.dma_semaphore, #tpu.memory_space<semaphore_mem>>)
    tpu.wait_dma2 semaphore(%arg2 : memref<!tpu.dma_semaphore, #tpu.memory_space<semaphore_mem>>) src(%arg0 : memref<2x4x16x16xf32, #tpu.memory_space<any>>) dst(%arg1 : memref<2x4x16x16xf32, #tpu.memory_space<any>>)
    return
  }
}

</mosaic_0001>

<bundles_post_ra>
// kernel: tpu_custom_call.1
= control target key start
LH: loop header
LB: loop body
LE: loop exit
PB: predicated region body
PF: predicated region fallthrough
CT: control target
= control target key end

     0   :  { %s34_s12 = smov [#allocation2]   ;;  %s35_s13 = smov [#allocation3]   ;;  %s53_s0 = inlined_call_operand.hbm [shape: f32[2,4,16,16], index: 0, kind: input, shape index: {}]   ;;  %s54_s1 = inlined_call_operand.hbm [shape: f32[2,4,16,16], index: 1, kind: output, shape index: {}]  }
   0x1   :  { %s10_s8 = sshll.u32 %s53_s0, 4  ;;  %s12_s11 = sshll.u32 %s54_s1, 4  ;;  %s11_s8 = int_to_ptr.hbm [resolvable:$true] %s10_s8  ;;  %s13_s11 = int_to_ptr.hbm [resolvable:$true] %s12_s11 }
   0x2   :  { %s36_s14 = smov 0  }
   0x3   :  { %16 = dma.general %s11_s8, 2048, %s13_s11, %s34_s12, %s35_s13, [#allocation4], %s36_s14, 0  }
   0x4   :  { %32 = dma.done.wait [#allocation2], 2048 }
   0x5   :  { %33 = vsyncadd [#allocation2], 4294965248 }
   0x6   :  { %22 = vsyncmov [#allocation2] }
   0x9   :  { %s23_s15 = vpop.sfrf %22 }
   0xa   :  { %p28_p0 = scmp.ne.s32.totalorder %s23_s15, 0 }
   0xc   :  { %27 = shalt.err (%p28_p0)  }

</bundles_post_ra>
